<compile_context>
chip_gen: v7x
topology: tpu7x:2x2x1
jax: 0.10.0
libtpu: 0.0.40
codegen_flags: <defaults>
</compile_context>

<pallas_src>
import functools

import jax
import jax.numpy as jnp
from jax import lax
from jax.experimental import pallas as pl
from jax.experimental.pallas import tpu as pltpu

_LANES = 128
_MAX_BLOCK_ROWS = 2048  # f32: 2048*128*4 B = 1 MiB / block; in+out double-buffered ~ 4 MiB


def _hash_u32(x):
    """lowbias32 integer hash (xor-shift-multiply): cheap VPU ops, good avalanche."""
    x = x ^ (x >> jnp.uint32(16))
    x = x * jnp.uint32(0x7FEB352D)
    x = x ^ (x >> jnp.uint32(15))
    x = x * jnp.uint32(0x846CA68B)
    x = x ^ (x >> jnp.uint32(16))
    return x


def _uniform_from_bits(bits_u32):
    """uint32 bits -> float32 in [0, 1) via the mantissa trick (no int->float convert)."""
    f = lax.bitcast_convert_type(
        (bits_u32 >> jnp.uint32(9)) | jnp.uint32(0x3F800000), jnp.float32
    )
    return f - jnp.float32(1.0)


def _gaussian_noise_kernel(seed_ref, x_ref, o_ref, *, sigma):
    rows, lanes = x_ref.shape
    half = rows // 2

    # One Box-Muller pair per (row, lane) of the top half of the block; the pair's
    # two normals feed row r (top half) and row r + half (bottom half).
    row = lax.broadcasted_iota(jnp.int32, (half, lanes), 0)
    col = lax.broadcasted_iota(jnp.int32, (half, lanes), 1)
    pair_idx = pl.program_id(0) * (half * lanes) + row * lanes + col

    # Two interleaved counter streams, offset by the (pre-mixed) seed.  All counter
    # math stays in int32; wrap-around matches uint32 modular arithmetic.
    base = pair_idx * 2 + seed_ref[0] * 2
    c1 = lax.bitcast_convert_type(base, jnp.uint32)
    c2 = lax.bitcast_convert_type(base + 1, jnp.uint32)

    bits1 = _hash_u32(c1)
    bits2 = _hash_u32(c2)

    u1 = jnp.float32(1.0) - _uniform_from_bits(bits1)  # (0, 1]  -> safe for log
    u2 = _uniform_from_bits(bits2)                      # [0, 1)

    # Box-Muller, using BOTH outputs of the pair.
    r = jnp.sqrt(jnp.float32(-2.0) * jnp.log(u1))
    theta = jnp.float32(2.0 * jnp.pi) * u2
    z0 = r * jnp.cos(theta)
    z1 = r * jnp.sin(theta)

    sig = jnp.float32(sigma)
    # TODO(synk): for bf16 activations on v6e/v7x the add/store could stay in bf16.
    o_ref[:half, :] = (x_ref[:half, :].astype(jnp.float32) + sig * z0).astype(o_ref.dtype)
    o_ref[half:, :] = (x_ref[half:, :].astype(jnp.float32) + sig * z1).astype(o_ref.dtype)


def gaussian_noise(x, seed, *, sigma=1.0, training=True):
    """Equivalent of GaussianNoise.forward: x + sigma * randn_like(x) when training."""
    if not training:
        return x

    orig_shape = x.shape
    orig_dtype = x.dtype

    flat = x.reshape(-1)
    n = flat.shape[0]
    pad = (-n) % (8 * _LANES)          # only pad when not already (8,128)-aligned
    if pad:
        flat = jnp.pad(flat, (0, pad))
    x2d = flat.reshape(-1, _LANES)
    rows = x2d.shape[0]

    block_rows = min(_MAX_BLOCK_ROWS, rows)
    grid = (pl.cdiv(rows, block_rows),)

    # Pre-mix the seed outside the kernel (cheap scalar XLA ops) so the kernel only
    # needs integer adds to fold it into the counters.
    seed_u = jnp.asarray(seed, dtype=jnp.uint32)
    mixed = _hash_u32(seed_u ^ jnp.uint32(0x9E3779B9))
    seed_arr = lax.bitcast_convert_type(mixed, jnp.int32).reshape(1)

    n_elems = rows * _LANES
    cost = pl.CostEstimate(
        flops=30 * n_elems,                # hash + Box-Muller arithmetic per element
        transcendentals=2 * n_elems,       # log+sqrt+cos+sin per pair = 2 / element
        bytes_accessed=int(2 * n_elems * jnp.dtype(orig_dtype).itemsize),
    )

    out2d = pl.pallas_call(
        functools.partial(_gaussian_noise_kernel, sigma=float(sigma)),
        out_shape=jax.ShapeDtypeStruct(x2d.shape, orig_dtype),
        grid=grid,
        in_specs=[
            pl.BlockSpec(memory_space=pltpu.MemorySpace.SMEM),       # mixed seed scalar
            pl.BlockSpec((block_rows, _LANES), lambda i: (i, 0)),    # x tile
        ],
        out_specs=pl.BlockSpec((block_rows, _LANES), lambda i: (i, 0)),
        compiler_params=pltpu.CompilerParams(
            dimension_semantics=("parallel",),
            vmem_limit_bytes=32 * 1024 * 1024,
        ),
        cost_estimate=cost,
    )(seed_arr, x2d)

    out = out2d.reshape(-1)
    if pad:
        out = out[:n]
    return out.reshape(orig_shape)


if __name__ == "__main__":
    key = jax.random.PRNGKey(0)
    # NCHW input, as the PyTorch module would receive from a conv stack.
    x = jax.random.normal(key, (2, 4, 16, 16), dtype=jnp.float32)

    # training=True path: adds sigma * N(0,1) noise inside the Pallas kernel.
    y_train = gaussian_noise(x, seed=0, sigma=1.0, training=True)
    y_train = jax.block_until_ready(y_train)

    # eval path: identity (matches the PyTorch module when self.training is False).
    y_eval = gaussian_noise(x, seed=0, sigma=1.0, training=False)
    y_eval = jax.block_until_ready(y_eval)

    assert y_train.shape == x.shape and y_train.dtype == x.dtype
    assert bool(jnp.all(y_eval == x))

    # Sanity: added noise has roughly zero mean / unit std (loose bounds).
    noise = y_train - x
    m = float(jnp.mean(noise))
    s = float(jnp.std(noise))
    assert abs(m) < 0.2 and 0.7 < s < 1.3, (m, s)

    print("KERNEL_OK")
</pallas_src>

<mosaic_0001>
module attributes {stable_mosaic.version = 11 : i64} {
  func.func @_gaussian_noise_kernel(%arg0: i32, %arg1: memref<1xi32, #tpu.memory_space<smem>>, %arg2: memref<16x128xf32, #tpu.memory_space<vmem>>, %arg3: memref<16x128xf32, #tpu.memory_space<vmem>>) attributes {dimension_semantics = [#tpu.dimension_semantics<parallel>], iteration_bounds = array<i64: 1>, scalar_prefetch = 0 : i64, scratch_operands = 0 : i64, tpu.core_type = #tpu.core_type<tc>, window_params = [{transform_indices = @transform_0, window_bounds = array<i64: 1>}, {transform_indices = @transform_1, window_bounds = array<i64: 16, 128>}, {transform_indices = @transform_2, window_bounds = array<i64: 16, 128>}]} {
    %0 = tpu.iota {dimensions = array<i32: 0>} : vector<8x128xi32>
    %1 = tpu.iota {dimensions = array<i32: 1>} : vector<8x128xi32>
    %c1024_i32 = arith.constant 1024 : i32
    %2 = arith.muli %arg0, %c1024_i32 : i32
    %c128_i32 = arith.constant 128 : i32
    %3 = vector.broadcast %c128_i32 : i32 to vector<8x128xi32>
    %4 = arith.muli %0, %3 : vector<8x128xi32>
    %5 = vector.broadcast %2 : i32 to vector<8x128xi32>
    %6 = arith.addi %5, %4 : vector<8x128xi32>
    %7 = arith.addi %6, %1 : vector<8x128xi32>
    %c2_i32 = arith.constant 2 : i32
    %8 = vector.broadcast %c2_i32 : i32 to vector<8x128xi32>
    %9 = arith.muli %7, %8 : vector<8x128xi32>
    %c0 = arith.constant 0 : index
    %10 = memref.load %arg1[%c0] : memref<1xi32, #tpu.memory_space<smem>>
    %c2_i32_0 = arith.constant 2 : i32
    %11 = arith.muli %10, %c2_i32_0 : i32
    %12 = vector.broadcast %11 : i32 to vector<8x128xi32>
    %13 = arith.addi %9, %12 : vector<8x128xi32>
    %14 = tpu.bitcast %13 : vector<8x128xi32> -> vector<8x128xi32>
    %c1_i32 = arith.constant 1 : i32
    %15 = vector.broadcast %c1_i32 : i32 to vector<8x128xi32>
    %16 = arith.addi %13, %15 : vector<8x128xi32>
    %17 = tpu.bitcast %16 : vector<8x128xi32> -> vector<8x128xi32>
    %c16_i32 = arith.constant 16 : i32
    %18 = vector.broadcast %c16_i32 : i32 to vector<8x128xi32>
    %19 = arith.shrui %14, %18 : vector<8x128xi32>
    %20 = arith.xori %14, %19 : vector<8x128xi32>
    %c2146121005_i32 = arith.constant 2146121005 : i32
    %21 = vector.broadcast %c2146121005_i32 : i32 to vector<8x128xi32>
    %22 = arith.muli %20, %21 : vector<8x128xi32>
    %c15_i32 = arith.constant 15 : i32
    %23 = vector.broadcast %c15_i32 : i32 to vector<8x128xi32>
    %24 = arith.shrui %22, %23 : vector<8x128xi32>
    %25 = arith.xori %22, %24 : vector<8x128xi32>
    %c-2073254261_i32 = arith.constant -2073254261 : i32
    %26 = vector.broadcast %c-2073254261_i32 : i32 to vector<8x128xi32>
    %27 = arith.muli %25, %26 : vector<8x128xi32>
    %c16_i32_1 = arith.constant 16 : i32
    %28 = vector.broadcast %c16_i32_1 : i32 to vector<8x128xi32>
    %29 = arith.shrui %27, %28 : vector<8x128xi32>
    %30 = arith.xori %27, %29 : vector<8x128xi32>
    %c16_i32_2 = arith.constant 16 : i32
    %31 = vector.broadcast %c16_i32_2 : i32 to vector<8x128xi32>
    %32 = arith.shrui %17, %31 : vector<8x128xi32>
    %33 = arith.xori %17, %32 : vector<8x128xi32>
    %c2146121005_i32_3 = arith.constant 2146121005 : i32
    %34 = vector.broadcast %c2146121005_i32_3 : i32 to vector<8x128xi32>
    %35 = arith.muli %33, %34 : vector<8x128xi32>
    %c15_i32_4 = arith.constant 15 : i32
    %36 = vector.broadcast %c15_i32_4 : i32 to vector<8x128xi32>
    %37 = arith.shrui %35, %36 : vector<8x128xi32>
    %38 = arith.xori %35, %37 : vector<8x128xi32>
    %c-2073254261_i32_5 = arith.constant -2073254261 : i32
    %39 = vector.broadcast %c-2073254261_i32_5 : i32 to vector<8x128xi32>
    %40 = arith.muli %38, %39 : vector<8x128xi32>
    %c16_i32_6 = arith.constant 16 : i32
    %41 = vector.broadcast %c16_i32_6 : i32 to vector<8x128xi32>
    %42 = arith.shrui %40, %41 : vector<8x128xi32>
    %43 = arith.xori %40, %42 : vector<8x128xi32>
    %c9_i32 = arith.constant 9 : i32
    %44 = vector.broadcast %c9_i32 : i32 to vector<8x128xi32>
    %45 = arith.shrui %30, %44 : vector<8x128xi32>
    %c1065353216_i32 = arith.constant 1065353216 : i32
    %46 = vector.broadcast %c1065353216_i32 : i32 to vector<8x128xi32>
    %47 = arith.ori %45, %46 : vector<8x128xi32>
    %48 = tpu.bitcast %47 : vector<8x128xi32> -> vector<8x128xf32>
    %cst = arith.constant 1.000000e+00 : f32
    %49 = vector.broadcast %cst : f32 to vector<8x128xf32>
    %50 = arith.subf %48, %49 : vector<8x128xf32>
    %cst_7 = arith.constant 1.000000e+00 : f32
    %51 = vector.broadcast %cst_7 : f32 to vector<8x128xf32>
    %52 = arith.subf %51, %50 : vector<8x128xf32>
    %c9_i32_8 = arith.constant 9 : i32
    %53 = vector.broadcast %c9_i32_8 : i32 to vector<8x128xi32>
    %54 = arith.shrui %43, %53 : vector<8x128xi32>
    %c1065353216_i32_9 = arith.constant 1065353216 : i32
    %55 = vector.broadcast %c1065353216_i32_9 : i32 to vector<8x128xi32>
    %56 = arith.ori %54, %55 : vector<8x128xi32>
    %57 = tpu.bitcast %56 : vector<8x128xi32> -> vector<8x128xf32>
    %cst_10 = arith.constant 1.000000e+00 : f32
    %58 = vector.broadcast %cst_10 : f32 to vector<8x128xf32>
    %59 = arith.subf %57, %58 : vector<8x128xf32>
    %60 = math.log %52 : vector<8x128xf32>
    %cst_11 = arith.constant -2.000000e+00 : f32
    %61 = vector.broadcast %cst_11 : f32 to vector<8x128xf32>
    %62 = arith.mulf %61, %60 : vector<8x128xf32>
    %63 = math.sqrt %62 : vector<8x128xf32>
    %cst_12 = arith.constant 6.28318548 : f32
    %64 = vector.broadcast %cst_12 : f32 to vector<8x128xf32>
    %65 = arith.mulf %64, %59 : vector<8x128xf32>
    %66 = math.cos %65 : vector<8x128xf32>
    %67 = arith.mulf %63, %66 : vector<8x128xf32>
    %68 = math.sin %65 : vector<8x128xf32>
    %69 = arith.mulf %63, %68 : vector<8x128xf32>
    %c0_13 = arith.constant 0 : index
    %c0_14 = arith.constant 0 : index
    %70 = vector.load %arg2[%c0_13, %c0_14] : memref<16x128xf32, #tpu.memory_space<vmem>>, vector<8x128xf32>
    %cst_15 = arith.constant 1.000000e+00 : f32
    %71 = vector.broadcast %cst_15 : f32 to vector<8x128xf32>
    %72 = arith.mulf %71, %67 : vector<8x128xf32>
    %73 = arith.addf %70, %72 : vector<8x128xf32>
    %c0_16 = arith.constant 0 : index
    %c0_17 = arith.constant 0 : index
    %74 = vector.load %arg3[%c0_16, %c0_17] : memref<16x128xf32, #tpu.memory_space<vmem>>, vector<8x128xf32>
    tpu.vector_store %arg3[%c0_16, %c0_17], %73 {strides = array<i32>} : memref<16x128xf32, #tpu.memory_space<vmem>>, vector<8x128xf32>,
    %c8 = arith.constant 8 : index
    %c0_18 = arith.constant 0 : index
    %75 = vector.load %arg2[%c8, %c0_18] : memref<16x128xf32, #tpu.memory_space<vmem>>, vector<8x128xf32>
    %cst_19 = arith.constant 1.000000e+00 : f32
    %76 = vector.broadcast %cst_19 : f32 to vector<8x128xf32>
    %77 = arith.mulf %76, %69 : vector<8x128xf32>
    %78 = arith.addf %75, %77 : vector<8x128xf32>
    %c8_20 = arith.constant 8 : index
    %c0_21 = arith.constant 0 : index
    %79 = vector.load %arg3[%c8_20, %c0_21] : memref<16x128xf32, #tpu.memory_space<vmem>>, vector<8x128xf32>
    tpu.vector_store %arg3[%c8_20, %c0_21], %78 {strides = array<i32>} : memref<16x128xf32, #tpu.memory_space<vmem>>, vector<8x128xf32>,
    return
  }
  func.func @transform_0(%arg0: i32) -> i32 {
    %c0_i32 = arith.constant 0 : i32
    %c0_i32_0 = arith.constant 0 : i32
    return %c0_i32 : i32
  }
  func.func @transform_1(%arg0: i32) -> (i32, i32) {
    %c0_i32 = arith.constant 0 : i32
    %c0_i32_0 = arith.constant 0 : i32
    return %arg0, %c0_i32 : i32, i32
  }
  func.func @transform_2(%arg0: i32) -> (i32, i32) {
    %c0_i32 = arith.constant 0 : i32
    %c0_i32_0 = arith.constant 0 : i32
    return %arg0, %c0_i32 : i32, i32
  }
}

</mosaic_0001>

<bundles_post_ra>
// kernel: tpu_custom_call.1
= control target key start
LH: loop header
LB: loop body
LE: loop exit
PB: predicated region body
PF: predicated region fallthrough
CT: control target
= control target key end

     0   :  { %8 = vsyncpa [#allocation4], 0  ;;  %s470_s0 = inlined_call_operand.<no memory space> [shape: s32[1], index: 0, kind: input, shape index: {}]   ;;  %s471_s1 = inlined_call_operand.hbm [shape: f32[16,128], index: 1, kind: input, shape index: {}]   ;;  %s472_s2 = inlined_call_operand.hbm [shape: f32[16,128], index: 2, kind: output, shape index: {}]  }
   0x1   :  { %9 = vsyncpa [#allocation5], 0  ;;  %s391_s9 = smov [#allocation3]   ;;  %s343_s13 = scalar_lea.hbm %s471_s1, 256 }
   0x2   :  { %s17_s10 = sshll.u32 %s391_s9, 4  ;;  %p344_p0 = scmp.ne.s32.totalorder %s471_s1, %s343_s13  ;;  %s18_s10 = int_to_ptr.vmem [resolvable:$true] %s17_s10 }
   0x3   :  { %p347_p1 = scmp.lt.u32.totalorder %s343_s13, %s471_s1 }
   0x5   :  { %p349_p2 = pnand %p347_p1, %p344_p0 }
   0x7   :  { %352 = shalt.err (!%p349_p2)
}
   0x8   :  { %s353_s18 = scalar_lea.vmem %s18_s10, 256  ;;  %p358_p4 = scmp.lt.s32.totalorder %s18_s10, %s18_s10 }
   0x9   :  { %p354_p3 = scmp.ne.s32.totalorder %s18_s10, %s353_s18  ;;  %p359_p5 = scmp.lt.s32.totalorder %s353_s18, %s353_s18 }
   0xb   :  { %p360_p6 = por %p359_p5, %p358_p4 }
   0xd   :  { %p361_p7 = pnand %p360_p6, %p354_p3 }
   0xf   :  { %364 = shalt.err (!%p361_p7)
}
  0x10   :  { %s392_s19 = smov 128   ;;  %s393_s20 = smov 8  }
  0x11   :  { %23 = dma.hbm_to_vmem [thread:$0]  %s471_s1, 256, %s18_s10, [#allocation4], %s392_s19, %s392_s19, %s393_s20  }
  0x12   :  { %387 = dma.done.wait [#allocation4], 256  }
  0x13   :  { %388 = vsyncadd [#allocation4], 4294967040  ;;  %v27_v0 = vlaneseq  ;;  %s310_s25 = sshll.u32 %s470_s0, 1  ;;  %v394_v39 = vmov 683565275   ;;  %s400_s0 = smov [#allocation6]  }
  0x14   :  { %v39_v5 = vstv %s310_s25  ;;  %v395_v41 = vmov 2475754826   ;;  %v396_v43 = vmov 2131351028   ;;  %v397_v50 = vmov 2102212464  }
  0x15   :  { %v28_v1 = vshrl.u32 %v27_v0, 7  ;;  %v30_v2 = vand.u32 127, %v27_v0  ;;  %v398_v53 = vmov 920167782   ;;  %v399_v56 = vmov 1326507024  }
  0x16   :  { %s298_s1 = sshll.u32 %s400_s0, 4  ;;  %s299_s1 = int_to_ptr.vmem [resolvable:$true] %s298_s1 }
  0x17   :  { %v32_v3 = vmul.u32 128, %v28_v1  ;;  %s365_s26 = scalar_lea.vmem %s299_s1, 256  ;;  %p370_p9 = scmp.lt.s32.totalorder %s299_s1, %s299_s1 }
  0x18   :  { %p366_p8 = scmp.ne.s32.totalorder %s299_s1, %s365_s26  ;;  %p371_p10 = scmp.lt.s32.totalorder %s365_s26, %s365_s26 }
  0x19   :  { %v35_v4 = vadd.s32 %v32_v3, %v30_v2 }
  0x1a   :  { %p372_p11 = por %p371_p10, %p370_p9 }
  0x1b   :  { %v36_v6 = vmul.u32 2, %v35_v4 }
  0x1c   :  { %p373_p12 = pnand %p372_p11, %p366_p8 }
  0x1d   :  { %v40_v7 = vadd.s32 %v39_v5, %v36_v6 }
  0x1f   :  { %v41_v8 = vadd.s32 1, %v40_v7  ;;  %v42_v14 = vshrl.u32 %v40_v7, 16 }
  0x21   :  { %v50_v9 = vshrl.u32 %v41_v8, 16  ;;  %v43_v17 = vxor.u32 %v42_v14, %v40_v7 }
  0x23   :  { %v51_v10 = vxor.u32 %v50_v9, %v41_v8  ;;  %v44_v20 = vmul.u32 2146121005, %v43_v17 }
  0x25   :  { %v52_v11 = vmul.u32 2146121005, %v51_v10  ;;  %v45_v23 = vshrl.u32 %v44_v20, 15 }
  0x27   :  { %v53_v12 = vshrl.u32 %v52_v11, 15  ;;  %v46_v26 = vxor.u32 %v45_v23, %v44_v20 }
  0x29   :  { %v54_v13 = vxor.u32 %v53_v12, %v52_v11  ;;  %v47_v30 = vmul.u32 2221713035, %v46_v26 }
  0x2b   :  { %v55_v15 = vmul.u32 2221713035, %v54_v13  ;;  %v48_v33 = vshrl.u32 %v47_v30, 16 }
  0x2d   :  { %v56_v16 = vshrl.u32 %v55_v15, 16  ;;  %v49_v45 = vxor.u32 %v48_v33, %v47_v30 }
  0x2f   :  { %v57_v18 = vxor.u32 %v56_v16, %v55_v15  ;;  %v58_v8 = vshrl.u32 %v49_v45, 9 }
  0x31   :  { %v63_v19 = vshrl.u32 %v57_v18, 9  ;;  %v59_v17 = vor.u32 1065353216, %v58_v8 }
  0x33   :  { %v64_v21 = vor.u32 1065353216, %v63_v19 }
  0x35   :  { %v312_v22 = vadd.f32 -1.0, %v64_v21  ;;  %v311_v21 = vadd.f32 -1.0, %v59_v17 }
  0x37   :  { %v434_v24 = vmul.f32 6.2831855, %v312_v22 }
  0x39   :  { %v81_v25 = vand.u32 2139095040, %v434_v24  ;;  %v78_v27 = vand.u32 2147483647, %v434_v24  ;;  %vm80_vm7 = vcmp.lt.s32.totalorder %v434_v24, 0 }
  0x3b   :  { %v82_v28 = vshrl.u32 %v81_v25, 23  ;;  %v85_v31 = vand.u32 8388607, %v78_v27  ;;  %v62_v25 = vsub.f32 1.0, %v311_v21  ;;  %vm79_vm8 = vcmp.le.f32.partialorder %v78_v27, 0.7853982 }
  0x3d   :  { %v313_v29 = vadd.s32 4294967169, %v82_v28  ;;  %v86_v34 = vor.u32 8388608, %v85_v31  ;;  %335 = vlog2.f32 %v62_v25 }
  0x3f   :  { %v88_v32 = vadd.s32 1, %v313_v29  ;;  %v126_v46 = vshll.u32 %v86_v34, 8 }
  0x41   :  { %vm89_vm0 = vcmp.gt.s32.totalorder %v88_v32, 0 }
  0x42   :  { %v90_v35 = vsel %vm89_vm0, %v88_v32, 0 }
  0x43   :  { %v92_v36 = vand.u32 31, %v90_v35  ;;  %v91_v37 = vshrl.u32 %v90_v35, 5 }
  0x45   :  { %v93_v38 = vsub.s32 32, %v92_v36  ;;  %v95_v40 = vshll.u32 %v394_v39, %v92_v36  ;;  %v98_v42 = vshll.u32 %v395_v41, %v92_v36  ;;  %v101_v44 = vshll.u32 %v396_v43, %v92_v36 }
  0x46   :  { %v104_v52 = vshll.u32 %v397_v50, %v92_v36  ;;  %v107_v55 = vshll.u32 %v398_v53, %v92_v36  ;;  %vm110_vm1 = vcmp.lt.s32.totalorder %v91_v37, 1  ;;  %vm111_vm2 = vcmp.lt.s32.totalorder %v91_v37, 2 }
  0x47   :  { %v94_v47 = vshrl.u32 %v394_v39, %v93_v38  ;;  %v96_v48 = vshrl.u32 %v395_v41, %v93_v38  ;;  %v99_v49 = vshrl.u32 %v396_v43, %v93_v38  ;;  %v102_v51 = vshrl.u32 %v397_v50, %v93_v38  ;;  %v336_v34 = vpop.eup %335 }
  0x48   :  { %v105_v54 = vshrl.u32 %v398_v53, %v93_v38  ;;  %v108_v57 = vshrl.u32 %v399_v56, %v93_v38  ;;  %vm112_vm3 = vcmp.lt.s32.totalorder %v91_v37, 3  ;;  %vm113_vm4 = vcmp.lt.s32.totalorder %v91_v37, 4 }
  0x49   :  { %v97_v58 = vor.u32 %v96_v48, %v95_v40  ;;  %v100_v59 = vor.u32 %v99_v49, %v98_v42  ;;  %v103_v60 = vor.u32 %v102_v51, %v101_v44  ;;  %v68_v39 = vmul.f32 0.6931472, %v336_v34 }
  0x4a   :  { %v106_v61 = vor.u32 %v105_v54, %v104_v52  ;;  %v109_v62 = vor.u32 %v108_v57, %v107_v55 }
  0x4b   :  { %v114_v63 = vsel %vm110_vm1, %v94_v47, %v97_v58  ;;  %v118_v0 = vsel %vm110_vm1, %v97_v58, %v100_v59  ;;  %v122_v1 = vsel %vm110_vm1, %v100_v59, %v103_v60  ;;  %v115_v2 = vsel %vm113_vm4, %v103_v60, 2102212464 }
  0x4c   :  { %v119_v3 = vsel %vm113_vm4, %v106_v61, 920167782  ;;  %v123_v4 = vsel %vm113_vm4, %v109_v62, 1326507024  ;;  %v116_v5 = vsel %vm112_vm3, %v100_v59, %v115_v2  ;;  %v69_v44 = vmul.f32 -2.0, %v68_v39 }
  0x4d   :  { %v120_v6 = vsel %vm112_vm3, %v103_v60, %v119_v3  ;;  %v124_v7 = vsel %vm112_vm3, %v106_v61, %v123_v4  ;;  %v117_v9 = vsel %vm111_vm2, %v114_v63, %v116_v5  ;;  %vm170_vm1 = vweird.f32 %v434_v24 }
  0x4e   :  { %v121_v10 = vsel %vm111_vm2, %v118_v0, %v120_v6  ;;  %v125_v11 = vsel %vm111_vm2, %v122_v1, %v124_v7  ;;  %v133_v16 = vmul.u32 %v126_v46, %v117_v9  ;;  %337 = vrsqrt.f32 %v69_v44  ;;  %v287_v9 = vld [vmem:[#allocation3] sm:$0xff] }
  0x4f   :  { %v440_v12 = vmul.u32.u64.low %v126_v46, %v125_v11  ;;  %v441_v13 = vmul.u32.u64.high %v126_v46, %v125_v11, %v440_v12  ;;  %v443_v14 = vmul.u32.u64.low %v126_v46, %v121_v10  ;;  %v444_v15 = vmul.u32.u64.high %v126_v46, %v121_v10, %v443_v14  ;;  %v290_v11 = vld [vmem:[#allocation3 + $0x8] sm:$0xff] }
  0x50   :  { %vm72_vm9 = vcmp.eq.f32.partialorder %v69_v44, inf  ;;  %vm74_vm10 = vcmp.eq.f32.partialorder %v69_v44, 0.0  ;;  %v75_v61 = vand.u32 2147483648, %v69_v44 }
  0x51   :  { %vm135_vm5 = vc.u32 %v441_v13, %v443_v14  ;;  %v136_v18 = vadd.s32 1, %v444_v15  ;;  %v134_v33 = vadd.s32 %v443_v14, %v441_v13 }
  0x53   :  { %v137_v19 = vsel %vm135_vm5, %v136_v18, %v444_v15 }
  0x54   :  { %v138_v20 = vadd.s32 %v137_v19, %v133_v16 }
  0x56   :  { %v139_v22 = vadd.s32 536870912, %v138_v20 }
  0x58   :  { %v140_v23 = vshrl.u32 %v139_v22, 30  ;;  %v338_v56 = vpop.eup %337 }
  0x59   :  { %v71_v59 = vmul.f32 %v338_v56, %v69_v44 }
  0x5a   :  { %v141_v26 = vshll.u32 %v140_v23, 30  ;;  %v164_v48 = vsub.s32 4, %v140_v23 }
  0x5b   :  { %v73_v62 = vsel %vm72_vm9, %v69_v44, %v71_v59 }
  0x5c   :  { %v142_v28 = vsub.s32 %v138_v20, %v141_v26  ;;  %v165_v51 = vsel %vm80_vm7, %v164_v48, %v140_v23  ;;  %v76_v3 = vsel %vm74_vm10, %v75_v61, %v73_v62 }
  0x5d   :  { %v167_v54 = vsel %vm79_vm8, 0, %v165_v51 }
  0x5e   :  { %v144_v29 = vsub.s32 0, %v142_v28  ;;  %v275_v55 = vadd.s32 3, %v167_v54  ;;  %v171_v57 = vand.u32 3, %v167_v54 }
  0x60   :  { %v314_v30 = vmin.u32 %v144_v29, %v142_v28  ;;  %v276_v58 = vand.u32 3, %v275_v55  ;;  %vm176_vm11 = vcmp.eq.s32.totalorder %v171_v57, 2  ;;  %vm173_vm13 = vcmp.eq.s32.totalorder %v171_v57, 0 }
  0x61   :  { %vm172_vm15 = vcmp.lt.s32.totalorder %v171_v57, 2 }
  0x62   :  { %v146_v31 = vclz %v314_v30  ;;  %vm281_vm12 = vcmp.eq.s32.totalorder %v276_v58, 2  ;;  %vm278_vm14 = vcmp.eq.s32.totalorder %v276_v58, 0  ;;  %vm277_vm0 = vcmp.lt.s32.totalorder %v276_v58, 2 }
  0x64   :  { %v315_v32 = vadd.s32 4294967294, %v146_v31 }
  0x66   :  { %vm316_vm6 = vcmp.lt.s32.totalorder %v315_v32, 0 }
  0x67   :  { %v149_v35 = vsel %vm316_vm6, 0, %v315_v32 }
  0x68   :  { %v150_v36 = vsub.s32 32, %v149_v35  ;;  %v151_v37 = vshll.u32 %v142_v28, %v149_v35  ;;  %v154_v38 = vsub.s32 4294967266, %v149_v35 }
  0x6a   :  { %v152_v40 = vshrl.u32 %v134_v33, %v150_v36  ;;  %v155_v41 = vadd.s32 127, %v154_v38 }
  0x6c   :  { %v153_v42 = vor.u32 %v152_v40, %v151_v37  ;;  %v156_v43 = vshll.u32 %v155_v41, 23 }
  0x6e   :  { %v157_v45 = vor.u32 4788187, %v156_v43  ;;  %v160_v46 = vcvt.s32.f32 %v153_v42 }
  0x70   :  { %v158_v47 = vand.u32 2147483647, %v157_v45 }
  0x72   :  { %v161_v49 = vmul.f32 %v160_v46, %v158_v47 }
  0x74   :  { %v162_v50 = vxor.u32 2147483648, %v161_v49 }
  0x76   :  { %v163_v52 = vsel %vm80_vm7, %v162_v50, %v161_v49 }
  0x77   :  { %v166_v53 = vsel %vm79_vm8, %v434_v24, %v163_v52 }
  0x78   :  { %339 = vcosq.f32 %v166_v53 }
  0x79   :  { %341 = vsinq.f32 %v166_v53 }
  0x82   :  { %v340_v60 = vpop.eup %339 }
  0x83   :  { %v342_v27 = vpop.eup %341  ;;  %v177_v63 = vxor.u32 2147483648, %v340_v60 }
  0x84   :  { %v174_v0 = vxor.u32 2147483648, %v342_v27 }
  0x85   :  { %v178_v1 = vsel %vm176_vm11, %v177_v63, %v342_v27  ;;  %v283_v2 = vsel %vm281_vm12, %v177_v63, %v342_v27 }
  0x86   :  { %v175_v4 = vsel %vm173_vm13, %v340_v60, %v174_v0  ;;  %v280_v5 = vsel %vm278_vm14, %v340_v60, %v174_v0 }
  0x87   :  { %v179_v6 = vsel %vm172_vm15, %v175_v4, %v178_v1  ;;  %v284_v7 = vsel %vm277_vm0, %v280_v5, %v283_v2 }
  0x88   :  { %v180_v8 = vsel %vm170_vm1, nan, %v179_v6  ;;  %v285_v10 = vsel %vm170_vm1, nan, %v284_v7 }
  0x89   :  { %v181_v12 = vmul.f32 %v180_v8, %v76_v3  ;;  %v286_v13 = vmul.f32 %v285_v10, %v76_v3 }
  0x8b   :  { %v288_v14 = vadd.f32 %v287_v9, %v181_v12  ;;  %v291_v15 = vadd.f32 %v290_v11, %v286_v13 }
  0x8d   :  { %289 = vst [vmem:[#allocation6] sm:$0xff] %v288_v14  ;;  %292 = vst [vmem:[#allocation6 + $0x8] sm:$0xff] %v291_v15 }
  0x8e   :  { %376 = shalt.err (!%p373_p12)
}
  0x8f   :  { %s377_s29 = scalar_lea.hbm %s472_s2, 256 }
  0x90   :  { %p378_p13 = scmp.ne.s32.totalorder %s472_s2, %s377_s29  ;;  %p381_p0 = scmp.lt.u32.totalorder %s377_s29, %s472_s2 }
  0x92   :  { %p383_p1 = pnand %p381_p0, %p378_p13 }
  0x94   :  { %386 = shalt.err (!%p383_p1)
}
  0x95   :  { %304 = dma.vmem_to_hbm [thread:$0]  %s299_s1, 256, %s472_s2, [#allocation5], %s392_s19, %s392_s19, %s393_s20  }
  0x96   :  { %389 = dma.done.wait [#allocation5], 256  }
  0x97   :  { %390 = vsyncadd [#allocation5], 4294967040 }
  0x98   :  { %308 = vsyncpa [#allocation4], 1 }
  0x99   :  { %309 = vsyncpa [#allocation5], 1 }

</bundles_post_ra>
